<compile_context>
chip_gen: v7x
topology: tpu7x:2x2x1
jax: 0.10.0
libtpu: 0.0.40
codegen_flags: <defaults>
</compile_context>

<pallas_src>
import jax
import jax.numpy as jnp
from jax.experimental import pallas as pl
from jax.experimental.pallas import tpu as pltpu


def _round_up(x, m):
    return ((x + m - 1) // m) * m


def _mlp_kernel(x_ref, wg_ref, wu_ref, wd_ref, o_ref, acc_ref):
    # x_ref:   (tm, H)      token rows, resident across the I (reduction) axis
    # wg_ref:  (H, ti)      gate_proj tile for this I step
    # wu_ref:  (H, ti)      up_proj tile for this I step
    # wd_ref:  (ti, H)      down_proj tile for this I step
    # o_ref:   (tm, H)      output tile (written on the last I step)
    # acc_ref: (tm, H) f32  VMEM accumulator
    j = pl.program_id(1)

    @pl.when(j == 0)
    def _():
        acc_ref[...] = jnp.zeros_like(acc_ref)

    x = x_ref[...]
    # Native-dtype MXU operands, f32 accumulation.
    gate = jnp.dot(x, wg_ref[...], preferred_element_type=jnp.float32)
    up = jnp.dot(x, wu_ref[...], preferred_element_type=jnp.float32)
    # SiLU / gating in f32 (sigmoid goes to the EUP slot; v5e has no bf16 VPU).
    h = (gate * jax.nn.sigmoid(gate)) * up
    acc_ref[...] += jnp.dot(h.astype(wd_ref.dtype), wd_ref[...],
                            preferred_element_type=jnp.float32)

    @pl.when(j == pl.num_programs(1) - 1)
    def _():
        o_ref[...] = acc_ref[...].astype(o_ref.dtype)


def _choose_tiles(M, H, I, x_item, w_item, budget, tm_max, gran):
    """Pick (tm, ti): big tm for arithmetic intensity, ti shrunk first for VMEM."""
    ti_opts = [c for c in (512, 384, 256, 128) if I % c == 0] or [I]
    tm = min(tm_max, max(gran, _round_up(M, gran)))

    def footprint(tm_, ti_):
        # Conservative: assume x/out are double-buffered (covers the fallback
        # path where pl.Buffered(1) is unavailable).
        return (2 * tm_ * H * x_item          # x
                + 2 * tm_ * H * x_item        # out
                + 2 * 2 * H * ti_ * w_item    # gate + up tiles (double buffered)
                + 2 * ti_ * H * w_item        # down tile (double buffered)
                + tm_ * H * 4)                # f32 accumulator

    while True:
        ti = next((t for t in ti_opts if footprint(tm, t) <= budget), None)
        if ti is not None or tm <= gran:
            ti = ti if ti is not None else ti_opts[-1]
            break
        tm = max(gran, _round_up(tm // 2, gran))
    return tm, ti, footprint(tm, ti)


def diffmamba_mlp(x, w_gate, w_up, w_down, *, tm_max=1024, compute_dtype=None):
    """x: [B, S, H]; w_gate/w_up: [H, I]; w_down: [I, H]  ->  [B, S, H].

    Weights are pre-transposed to [in, out] (nn.Linear stores [out, in]) — do
    that once at weight-load time.  For production, pass bf16 weights (or set
    compute_dtype=jnp.bfloat16) so the MXU runs its native fast path and HBM
    weight traffic halves; accumulation stays f32 either way.
    """
    orig_dtype = x.dtype
    if compute_dtype is not None:
        x = x.astype(compute_dtype)
        w_gate = w_gate.astype(compute_dtype)
        w_up = w_up.astype(compute_dtype)
        w_down = w_down.astype(compute_dtype)

    B, S, H = x.shape
    I = w_gate.shape[1]
    M = B * S
    x_item = jnp.dtype(x.dtype).itemsize
    w_item = jnp.dtype(w_gate.dtype).itemsize
    gran = max(8, 32 // x_item)  # sublane granularity for the row tile

    # ---- VMEM budget: respect the actual chip (v7x = 64 MiB) --------------
    try:
        vmem_cap = int(pltpu.get_tpu_info().vmem_capacity_bytes)
    except Exception:
        vmem_cap = 64 * 1024 * 1024  # conservative (v7x per-TC)
    budget = int(vmem_cap * 0.85)

    # ---- tile sizes --------------------------------------------------------
    tm, ti, tile_bytes = _choose_tiles(M, H, I, x_item, w_item, budget,
                                       tm_max, gran)
    M_pad = pl.cdiv(M, tm) * tm
    # Guarantee >= 2 parallel M tiles when M allows (v7x megacore: 2 TCs).
    if M_pad // tm < 2 and tm > gran:
        tm = max(gran, _round_up(tm // 2, gran))
        M_pad = pl.cdiv(M, tm) * tm
    n_i = I // ti
    n_m = M_pad // tm

    # ---- pad M to the row tile (zero rows pass through the MLP as zeros) --
    x2d = x.reshape(M, H)
    if M_pad != M:
        x2d = jnp.pad(x2d, ((0, M_pad - M), (0, 0)))

    # ---- cost estimate (weights are re-streamed once per M tile) ----------
    flops = 6 * M_pad * H * I                     # gate + up + down matmuls
    w_bytes = (w_gate.size + w_up.size + w_down.size) * w_item
    bytes_accessed = (x2d.size * x_item            # activations in
                      + M_pad * H * x_item         # activations out
                      + n_m * w_bytes)             # weights, per M tile
    cost = pl.CostEstimate(flops=int(flops), transcendentals=int(M_pad * I),
                           bytes_accessed=int(bytes_accessed))

    vmem_limit = min(budget, max(32 * 1024 * 1024, int(tile_bytes * 5 // 4)))

    def _build(single_buffer_io):
        io_kwargs = {}
        if single_buffer_io:
            # x / out block indices are constant across the inner j axis ->
            # double-buffering them is pure VMEM waste.
            io_kwargs = dict(pipeline_mode=pl.Buffered(1))
        x_spec = pl.BlockSpec((tm, H), lambda i, j: (i, 0), **io_kwargs)
        o_spec = pl.BlockSpec((tm, H), lambda i, j: (i, 0), **io_kwargs)
        return pl.pallas_call(
            _mlp_kernel,
            out_shape=jax.ShapeDtypeStruct((M_pad, H), x.dtype),
            grid_spec=pltpu.PrefetchScalarGridSpec(
                num_scalar_prefetch=0,
                grid=(n_m, n_i),
                in_specs=[
                    x_spec,                                        # x rows
                    pl.BlockSpec((H, ti), lambda i, j: (0, j)),    # gate tile
                    pl.BlockSpec((H, ti), lambda i, j: (0, j)),    # up tile
                    pl.BlockSpec((ti, H), lambda i, j: (j, 0)),    # down tile
                ],
                out_specs=o_spec,
                scratch_shapes=[pltpu.VMEM((tm, H), jnp.float32)],
            ),
            compiler_params=pltpu.CompilerParams(
                dimension_semantics=("parallel", "arbitrary"),
                vmem_limit_bytes=vmem_limit,
            ),
            cost_estimate=cost,
        )

    if hasattr(pl, "Buffered"):
        try:
            out2d = _build(True)(x2d, w_gate, w_up, w_down)
        except Exception:
            # pipeline_mode=pl.Buffered(1) unsupported on this build: fall back
            # to default double-buffering (correctness unaffected).
            out2d = _build(False)(x2d, w_gate, w_up, w_down)
    else:
        out2d = _build(False)(x2d, w_gate, w_up, w_down)

    out = out2d[:M].reshape(B, S, H)
    return out.astype(orig_dtype) if out.dtype != orig_dtype else out


def reference_mlp(x, w_gate, w_up, w_down):
    g = jnp.einsum("bsh,hi->bsi", x, w_gate)
    u = jnp.einsum("bsh,hi->bsi", x, w_up)
    h = (g * jax.nn.sigmoid(g)) * u
    return jnp.einsum("bsi,ih->bsh", h, w_down)


if __name__ == "__main__":
    key = jax.random.PRNGKey(0)

    # --- Test 1: toy config consistent with the module (hidden=32, inter=64,
    #             hidden_act="silu", pretraining_tp=1) ----------------------
    B, S, H, I = 2, 8, 32, 64
    kx, kg, ku, kd, key = jax.random.split(key, 5)
    x = jax.random.normal(kx, (B, S, H), dtype=jnp.float32)
    w_gate = jax.random.normal(kg, (H, I), dtype=jnp.float32) * 0.05
    w_up = jax.random.normal(ku, (H, I), dtype=jnp.float32) * 0.05
    w_down = jax.random.normal(kd, (I, H), dtype=jnp.float32) * 0.05

    out = jax.block_until_ready(diffmamba_mlp(x, w_gate, w_up, w_down))
    ref = reference_mlp(x, w_gate, w_up, w_down)
    assert out.shape == (B, S, H)
    assert jnp.allclose(out, ref, atol=1e-4, rtol=1e-4), "mismatch (toy)"

    # --- Test 2: exercises row padding (M=300), the >=2-parallel-tile split,
    #             and the I-tiled reduction / accumulator path (I=1024) -----
    B2, S2, H2, I2 = 3, 100, 256, 1024
    kx, kg, ku, kd, key = jax.random.split(key, 5)
    x2 = jax.random.normal(kx, (B2, S2, H2), dtype=jnp.float32)
    wg2 = jax.random.normal(kg, (H2, I2), dtype=jnp.float32) * 0.02
    wu2 = jax.random.normal(ku, (H2, I2), dtype=jnp.float32) * 0.02
    wd2 = jax.random.normal(kd, (I2, H2), dtype=jnp.float32) * 0.02

    out2 = jax.block_until_ready(diffmamba_mlp(x2, wg2, wu2, wd2))
    ref2 = reference_mlp(x2, wg2, wu2, wd2)
    assert out2.shape == (B2, S2, H2)
    assert jnp.allclose(out2, ref2, atol=1e-3, rtol=1e-3), "mismatch (tiled)"

    print("KERNEL_OK")
</pallas_src>

<mosaic_0001>
module attributes {stable_mosaic.version = 11 : i64} {
  func.func @_mlp_kernel(%arg0: i32, %arg1: i32, %arg2: memref<8x32xf32, #tpu.memory_space<vmem>>, %arg3: memref<32x64xf32, #tpu.memory_space<vmem>>, %arg4: memref<32x64xf32, #tpu.memory_space<vmem>>, %arg5: memref<64x32xf32, #tpu.memory_space<vmem>>, %arg6: memref<8x32xf32, #tpu.memory_space<vmem>>, %arg7: memref<8x32xf32, #tpu.memory_space<vmem>>) attributes {dimension_semantics = [#tpu.dimension_semantics<parallel>, #tpu.dimension_semantics<arbitrary>], iteration_bounds = array<i64: 2, 1>, scalar_prefetch = 0 : i64, scratch_operands = 1 : i64, tpu.core_type = #tpu.core_type<tc>, window_params = [{pipeline_mode = #tpu.pipeline_mode<synchronous>, transform_indices = @transform_0, window_bounds = array<i64: 8, 32>}, {transform_indices = @transform_1, window_bounds = array<i64: 32, 64>}, {transform_indices = @transform_2, window_bounds = array<i64: 32, 64>}, {transform_indices = @transform_3, window_bounds = array<i64: 64, 32>}, {pipeline_mode = #tpu.pipeline_mode<synchronous>, transform_indices = @transform_4, window_bounds = array<i64: 8, 32>}]} {
    %c0_i32 = arith.constant 0 : i32
    %0 = arith.cmpi eq, %arg1, %c0_i32 : i32
    %1 = arith.extui %0 : i1 to i32
    %c0_i32_0 = arith.constant 0 : i32
    %2 = arith.cmpi ne, %1, %c0_i32_0 : i32
    scf.if %2 {
      %cst_17 = arith.constant 0.000000e+00 : f32
      %23 = vector.broadcast %cst_17 : f32 to vector<8x32xf32>
      %c0_18 = arith.constant 0 : index
      %c0_19 = arith.constant 0 : index
      %24 = vector.load %arg7[%c0_18, %c0_19] : memref<8x32xf32, #tpu.memory_space<vmem>>, vector<8x32xf32>
      tpu.vector_store %arg7[%c0_18, %c0_19], %23 {strides = array<i32>} : memref<8x32xf32, #tpu.memory_space<vmem>>, vector<8x32xf32>,
    } else {
    }
    %c0 = arith.constant 0 : index
    %c0_1 = arith.constant 0 : index
    %3 = vector.load %arg2[%c0, %c0_1] : memref<8x32xf32, #tpu.memory_space<vmem>>, vector<8x32xf32>
    %c0_2 = arith.constant 0 : index
    %c0_3 = arith.constant 0 : index
    %4 = vector.load %arg3[%c0_2, %c0_3] : memref<32x64xf32, #tpu.memory_space<vmem>>, vector<32x64xf32>
    %cst = arith.constant dense<0.000000e+00> : vector<8x64xf32>
    %5 = tpu.matmul %3, %4, %cst {dimension_numbers = #tpu.dot_dimension_numbers<[1], [0], [0], [1], [0, 0, 1, 1], [], []>} : vector<8x32xf32>, vector<32x64xf32>, vector<8x64xf32> -> vector<8x64xf32>
    %c0_4 = arith.constant 0 : index
    %c0_5 = arith.constant 0 : index
    %6 = vector.load %arg4[%c0_4, %c0_5] : memref<32x64xf32, #tpu.memory_space<vmem>>, vector<32x64xf32>
    %cst_6 = arith.constant dense<0.000000e+00> : vector<8x64xf32>
    %7 = tpu.matmul %3, %6, %cst_6 {dimension_numbers = #tpu.dot_dimension_numbers<[1], [0], [0], [1], [0, 0, 1, 1], [], []>} : vector<8x32xf32>, vector<32x64xf32>, vector<8x64xf32> -> vector<8x64xf32>
    %8 = arith.negf %5 : vector<8x64xf32>
    %9 = math.exp %8 : vector<8x64xf32>
    %cst_7 = arith.constant 1.000000e+00 : f32
    %10 = vector.broadcast %cst_7 : f32 to vector<8x64xf32>
    %11 = arith.addf %10, %9 : vector<8x64xf32>
    %12 = arith.divf %10, %11 : vector<8x64xf32>
    %13 = arith.mulf %5, %12 : vector<8x64xf32>
    %14 = arith.mulf %13, %7 : vector<8x64xf32>
    %c0_8 = arith.constant 0 : index
    %c0_9 = arith.constant 0 : index
    %15 = vector.load %arg7[%c0_8, %c0_9] : memref<8x32xf32, #tpu.memory_space<vmem>>, vector<8x32xf32>
    %c0_10 = arith.constant 0 : index
    %c0_11 = arith.constant 0 : index
    %16 = vector.load %arg5[%c0_10, %c0_11] : memref<64x32xf32, #tpu.memory_space<vmem>>, vector<64x32xf32>
    %cst_12 = arith.constant dense<0.000000e+00> : vector<8x32xf32>
    %17 = tpu.matmul %14, %16, %cst_12 {dimension_numbers = #tpu.dot_dimension_numbers<[1], [0], [0], [1], [0, 0, 1, 1], [], []>} : vector<8x64xf32>, vector<64x32xf32>, vector<8x32xf32> -> vector<8x32xf32>
    %18 = arith.addf %15, %17 : vector<8x32xf32>
    %c0_13 = arith.constant 0 : index
    %c0_14 = arith.constant 0 : index
    %19 = vector.load %arg7[%c0_13, %c0_14] : memref<8x32xf32, #tpu.memory_space<vmem>>, vector<8x32xf32>
    tpu.vector_store %arg7[%c0_13, %c0_14], %18 {strides = array<i32>} : memref<8x32xf32, #tpu.memory_space<vmem>>, vector<8x32xf32>,
    %c0_i32_15 = arith.constant 0 : i32
    %20 = arith.cmpi eq, %arg1, %c0_i32_15 : i32
    %21 = arith.extui %20 : i1 to i32
    %c0_i32_16 = arith.constant 0 : i32
    %22 = arith.cmpi ne, %21, %c0_i32_16 : i32
    scf.if %22 {
      %c0_17 = arith.constant 0 : index
      %c0_18 = arith.constant 0 : index
      %23 = vector.load %arg7[%c0_17, %c0_18] : memref<8x32xf32, #tpu.memory_space<vmem>>, vector<8x32xf32>
      %c0_19 = arith.constant 0 : index
      %c0_20 = arith.constant 0 : index
      %24 = vector.load %arg6[%c0_19, %c0_20] : memref<8x32xf32, #tpu.memory_space<vmem>>, vector<8x32xf32>
      tpu.vector_store %arg6[%c0_19, %c0_20], %23 {strides = array<i32>} : memref<8x32xf32, #tpu.memory_space<vmem>>, vector<8x32xf32>,
    } else {
    }
    return
  }
  func.func @transform_0(%arg0: i32, %arg1: i32) -> (i32, i32) {
    %c0_i32 = arith.constant 0 : i32
    %c0_i32_0 = arith.constant 0 : i32
    return %arg0, %c0_i32 : i32, i32
  }
  func.func @transform_1(%arg0: i32, %arg1: i32) -> (i32, i32) {
    %c0_i32 = arith.constant 0 : i32
    %c0_i32_0 = arith.constant 0 : i32
    return %c0_i32, %arg1 : i32, i32
  }
  func.func @transform_2(%arg0: i32, %arg1: i32) -> (i32, i32) {
    %c0_i32 = arith.constant 0 : i32
    %c0_i32_0 = arith.constant 0 : i32
    return %c0_i32, %arg1 : i32, i32
  }
  func.func @transform_3(%arg0: i32, %arg1: i32) -> (i32, i32) {
    %c0_i32 = arith.constant 0 : i32
    %c0_i32_0 = arith.constant 0 : i32
    return %arg1, %c0_i32 : i32, i32
  }
  func.func @transform_4(%arg0: i32, %arg1: i32) -> (i32, i32) {
    %c0_i32 = arith.constant 0 : i32
    %c0_i32_0 = arith.constant 0 : i32
    return %arg0, %c0_i32 : i32, i32
  }
}

module attributes {stable_mosaic.version = 11 : i64} {
  func.func @_mlp_kernel(%arg0: i32, %arg1: i32, %arg2: memref<8x32xf32, #tpu.memory_space<vmem>>, %arg3: memref<32x64xf32, #tpu.memory_space<vmem>>, %arg4: memref<32x64xf32, #tpu.memory_space<vmem>>, %arg5: memref<64x32xf32, #tpu.memory_space<vmem>>, %arg6: memref<8x32xf32, #tpu.memory_space<vmem>>, %arg7: memref<8x32xf32, #tpu.memory_space<vmem>>) attributes {dimension_semantics = [#tpu.dimension_semantics<parallel>, #tpu.dimension_semantics<arbitrary>], iteration_bounds = array<i64: 2, 1>, scalar_prefetch = 0 : i64, scratch_operands = 1 : i64, tpu.core_type = #tpu.core_type<tc>, window_params = [{transform_indices = @transform_0, window_bounds = array<i64: 8, 32>}, {transform_indices = @transform_1, window_bounds = array<i64: 32, 64>}, {transform_indices = @transform_2, window_bounds = array<i64: 32, 64>}, {transform_indices = @transform_3, window_bounds = array<i64: 64, 32>}, {transform_indices = @transform_4, window_bounds = array<i64: 8, 32>}]} {
    %c0_i32 = arith.constant 0 : i32
    %0 = arith.cmpi eq, %arg1, %c0_i32 : i32
    %1 = arith.extui %0 : i1 to i32
    %c0_i32_0 = arith.constant 0 : i32
    %2 = arith.cmpi ne, %1, %c0_i32_0 : i32
    scf.if %2 {
      %cst_17 = arith.constant 0.000000e+00 : f32
      %23 = vector.broadcast %cst_17 : f32 to vector<8x32xf32>
      %c0_18 = arith.constant 0 : index
      %c0_19 = arith.constant 0 : index
      %24 = vector.load %arg7[%c0_18, %c0_19] : memref<8x32xf32, #tpu.memory_space<vmem>>, vector<8x32xf32>
      tpu.vector_store %arg7[%c0_18, %c0_19], %23 {strides = array<i32>} : memref<8x32xf32, #tpu.memory_space<vmem>>, vector<8x32xf32>,
    } else {
    }
    %c0 = arith.constant 0 : index
    %c0_1 = arith.constant 0 : index
    %3 = vector.load %arg2[%c0, %c0_1] : memref<8x32xf32, #tpu.memory_space<vmem>>, vector<8x32xf32>
    %c0_2 = arith.constant 0 : index
    %c0_3 = arith.constant 0 : index
    %4 = vector.load %arg3[%c0_2, %c0_3] : memref<32x64xf32, #tpu.memory_space<vmem>>, vector<32x64xf32>
    %cst = arith.constant dense<0.000000e+00> : vector<8x64xf32>
    %5 = tpu.matmul %3, %4, %cst {dimension_numbers = #tpu.dot_dimension_numbers<[1], [0], [0], [1], [0, 0, 1, 1], [], []>} : vector<8x32xf32>, vector<32x64xf32>, vector<8x64xf32> -> vector<8x64xf32>
    %c0_4 = arith.constant 0 : index
    %c0_5 = arith.constant 0 : index
    %6 = vector.load %arg4[%c0_4, %c0_5] : memref<32x64xf32, #tpu.memory_space<vmem>>, vector<32x64xf32>
    %cst_6 = arith.constant dense<0.000000e+00> : vector<8x64xf32>
    %7 = tpu.matmul %3, %6, %cst_6 {dimension_numbers = #tpu.dot_dimension_numbers<[1], [0], [0], [1], [0, 0, 1, 1], [], []>} : vector<8x32xf32>, vector<32x64xf32>, vector<8x64xf32> -> vector<8x64xf32>
    %8 = arith.negf %5 : vector<8x64xf32>
    %9 = math.exp %8 : vector<8x64xf32>
    %cst_7 = arith.constant 1.000000e+00 : f32
    %10 = vector.broadcast %cst_7 : f32 to vector<8x64xf32>
    %11 = arith.addf %10, %9 : vector<8x64xf32>
    %12 = arith.divf %10, %11 : vector<8x64xf32>
    %13 = arith.mulf %5, %12 : vector<8x64xf32>
    %14 = arith.mulf %13, %7 : vector<8x64xf32>
    %c0_8 = arith.constant 0 : index
    %c0_9 = arith.constant 0 : index
    %15 = vector.load %arg7[%c0_8, %c0_9] : memref<8x32xf32, #tpu.memory_space<vmem>>, vector<8x32xf32>
    %c0_10 = arith.constant 0 : index
    %c0_11 = arith.constant 0 : index
    %16 = vector.load %arg5[%c0_10, %c0_11] : memref<64x32xf32, #tpu.memory_space<vmem>>, vector<64x32xf32>
    %cst_12 = arith.constant dense<0.000000e+00> : vector<8x32xf32>
    %17 = tpu.matmul %14, %16, %cst_12 {dimension_numbers = #tpu.dot_dimension_numbers<[1], [0], [0], [1], [0, 0, 1, 1], [], []>} : vector<8x64xf32>, vector<64x32xf32>, vector<8x32xf32> -> vector<8x32xf32>
    %18 = arith.addf %15, %17 : vector<8x32xf32>
    %c0_13 = arith.constant 0 : index
    %c0_14 = arith.constant 0 : index
    %19 = vector.load %arg7[%c0_13, %c0_14] : memref<8x32xf32, #tpu.memory_space<vmem>>, vector<8x32xf32>
    tpu.vector_store %arg7[%c0_13, %c0_14], %18 {strides = array<i32>} : memref<8x32xf32, #tpu.memory_space<vmem>>, vector<8x32xf32>,
    %c0_i32_15 = arith.constant 0 : i32
    %20 = arith.cmpi eq, %arg1, %c0_i32_15 : i32
    %21 = arith.extui %20 : i1 to i32
    %c0_i32_16 = arith.constant 0 : i32
    %22 = arith.cmpi ne, %21, %c0_i32_16 : i32
    scf.if %22 {
      %c0_17 = arith.constant 0 : index
      %c0_18 = arith.constant 0 : index
      %23 = vector.load %arg7[%c0_17, %c0_18] : memref<8x32xf32, #tpu.memory_space<vmem>>, vector<8x32xf32>
      %c0_19 = arith.constant 0 : index
      %c0_20 = arith.constant 0 : index
      %24 = vector.load %arg6[%c0_19, %c0_20] : memref<8x32xf32, #tpu.memory_space<vmem>>, vector<8x32xf32>
      tpu.vector_store %arg6[%c0_19, %c0_20], %23 {strides = array<i32>} : memref<8x32xf32, #tpu.memory_space<vmem>>, vector<8x32xf32>,
    } else {
    }
    return
  }
  func.func @transform_0(%arg0: i32, %arg1: i32) -> (i32, i32) {
    %c0_i32 = arith.constant 0 : i32
    %c0_i32_0 = arith.constant 0 : i32
    return %arg0, %c0_i32 : i32, i32
  }
  func.func @transform_1(%arg0: i32, %arg1: i32) -> (i32, i32) {
    %c0_i32 = arith.constant 0 : i32
    %c0_i32_0 = arith.constant 0 : i32
    return %c0_i32, %arg1 : i32, i32
  }
  func.func @transform_2(%arg0: i32, %arg1: i32) -> (i32, i32) {
    %c0_i32 = arith.constant 0 : i32
    %c0_i32_0 = arith.constant 0 : i32
    return %c0_i32, %arg1 : i32, i32
  }
  func.func @transform_3(%arg0: i32, %arg1: i32) -> (i32, i32) {
    %c0_i32 = arith.constant 0 : i32
    %c0_i32_0 = arith.constant 0 : i32
    return %arg1, %c0_i32 : i32, i32
  }
  func.func @transform_4(%arg0: i32, %arg1: i32) -> (i32, i32) {
    %c0_i32 = arith.constant 0 : i32
    %c0_i32_0 = arith.constant 0 : i32
    return %arg0, %c0_i32 : i32, i32
  }
}

</mosaic_0001>

<bundles_post_ra>
// kernel: tpu_custom_call.1
= control target key start
LH: loop header
LB: loop body
LE: loop exit
PB: predicated region body
PF: predicated region fallthrough
CT: control target
= control target key end

     0   :  { %9 = vsyncpa [#allocation4], 0  ;;  %s867_s15 = smov 0   ;;  %s869_s16 = smov 0   ;;  %s1003_s0 = inlined_call_operand.vmem [shape: f32[16,32], index: 0, kind: input, shape index: {}]   ;;  %s1004_s1 = inlined_call_operand.vmem [shape: f32[32,64], index: 1, kind: input, shape index: {}]   ;;  %s1005_s2 = inlined_call_operand.vmem [shape: f32[32,64], index: 2, kind: input, shape index: {}]   ;;  %s1006_s3 = inlined_call_operand.vmem [shape: f32[64,32], index: 3, kind: input, shape index: {}]   ;;  %s1007_s4 = inlined_call_operand.hbm [shape: f32[16,32], index: 4, kind: output, shape index: {}]  }
   0x1   :  { %s871_s17 = smov 0   ;;  %s873_s18 = smov 0  }
   0x2   :  { %s875_s19 = smov 0  }
   0x3 LB: > { %s618_s20 = sadd.s32 4294967295, %s836_s19   ;;  %s27_s21 = sadd.s32 1, %s832_s18  ;;  %s836_s19 = sphi %s875_s19, %s15_s19   ;;  %s832_s18 = sphi %s873_s18, %s1012_s18   ;;  %s828_s17 = sphi %s871_s17, %s1011_s17   ;;  %s824_s16 = sphi %s869_s16, %s1010_s16   ;;  %s820_s15 = sphi %s867_s15, %s1009_s15  }
   0x4   : > { %p29_p0 = scmp.ge.s32.totalorder %s27_s21, 2  ;;  %s138_s22 = sadd.s32 1, %s824_s16 }
   0x5   : > { %p148_p1 = scmp.ne.s32.totalorder %s824_s16, %s820_s15  ;;  %p149_p2 = scmp.eq.s32.totalorder %s618_s20, 1 }
   0x6   : > { %s1014_s21 = smov (%p29_p0, %s27_s21), 0  ;;  %p623_p4 = scmp.ge.s32.totalorder %s836_s19, 1 }
   0x7   : > { %p896_p3 = por %p149_p2, %p148_p1  ;;  %s135_s24 = ssub.s32 %s832_s18, %s1014_s21 }
   0x8   : > { %p203_p5 = scmp.lt.s32.totalorder %s836_s19, 3  ;;  %p136_p6 = scmp.eq.s32.totalorder %s135_s24, 0 }
   0xa   : > { %p204_p7 = pnand %p623_p4, %p203_p5 }
   0xb   : > { %s905_s25 = scalar_select %p136_p6, %s824_s16, %s138_s22  }
   0xc   : > { %207 = sbr.rel (%p204_p7) target bundleno = 504 (0x1f8), region = 36  ;;  %v261_v0 = vld [vmem:[%s1004_s1] sm:$0xff] (!%p204_p7)  ;;  %v262_v1 = vld [vmem:[%s1004_s1 + $0x8] sm:$0xff] (!%p204_p7)  ;;  %v263_v2 = vld [vmem:[%s1004_s1 + $0x10] sm:$0xff] (!%p204_p7)  ;;  %v838_v3 = vmov (!%p204_p7), 0.0|0.0   ;;  %vm839_vm0 = vmmov (!%p204_p7), 0  }
   0xd   : > { %692 = vmatprep.subr.bf16.mxu1 (!%p204_p7), %v838_v3  ;;  %v693_v4 = vpack.c.bf16 (!%p204_p7), %v262_v1, %v261_v0  ;;  %v264_v5 = vld [vmem:[%s1004_s1 + $0x18] sm:$0xff] (!%p204_p7)  ;;  %v840_v6 = vmov (!%p204_p7), 0.0   ;;  %p236_p8 = scmp.lt.s32.totalorder (!%p204_p7), %s828_s17, 1  ;;  %vm258_vm1 = vcmask (!%p204_p7), 261120   ;;  %704 = vmatprep.subr.bf16.mxu0 (!%p204_p7), %v838_v3  ;;  %v339_v8 = vld [vmem:[%s1005_s2] sm:$0xff] (!%p204_p7)  ;;  %v340_v9 = vld [vmem:[%s1005_s2 + $0x8] sm:$0xff] (!%p204_p7) }
   0xe   : > { %659 = vmatprep.mubr.msk.f32.mxu1 (!%p204_p7), %vm839_vm0, %v840_v6  ;;  %259 = vst.msk [vmem:[#allocation2] sm:$0xff] (!%p204_p7), %vm258_vm1, %v840_v6  ;;  %689 = vmatprep.mubr.msk.f32.mxu0 (!%p204_p7), %vm839_vm0, %v840_v6  ;;  %v696_v7 = vpack.c.bf16 (!%p204_p7), %v264_v5, %v263_v2  ;;  %v699_v11 = vpack.c.bf16 (!%p204_p7), %v340_v9, %v339_v8  ;;  %v341_v12 = vld [vmem:[%s1005_s2 + $0x10] sm:$0xff] (!%p204_p7)  ;;  %v342_v13 = vld [vmem:[%s1005_s2 + $0x18] sm:$0xff] (!%p204_p7)  ;;  %v422_v15 = vld [vmem:[%s1006_s3] sm:$0xff] (!%p204_p7)  ;;  %vm430_vm2 = vcmask (!%p204_p7), 523264   ;;  %s629_s24 = sshll.u32 (!%p204_p7), %s828_s17, 7 }
   0xf   : > { %694 = vmatpush3.bf16.msra.mxu1 (!%p204_p7), %v693_v4  ;;  %v702_v14 = vpack.c.bf16 (!%p204_p7), %v342_v13, %v341_v12  ;;  %v423_v16 = vld [vmem:[%s1006_s3 + $0x8] sm:$0xff] (!%p204_p7)  ;;  %v424_v18 = vld [vmem:[%s1006_s3 + $0x10] sm:$0xff] (!%p204_p7)  ;;  %v425_v19 = vld [vmem:[%s1006_s3 + $0x18] sm:$0xff] (!%p204_p7)  ;;  %s841_s26 = smov (!%p204_p7), [#allocation3]   ;;  %s518_s30 = scalar_lea.hbm (!%p204_p7), %s1007_s4, %s629_s24 }
  0x10   : > { %695 = vmatprep.subr.bf16.mxu1 (!%p204_p7), %v838_v3  ;;  %v705_v17 = vpack.c.bf16 (!%p204_p7), %v423_v16, %v422_v15  ;;  %v708_v20 = vpack.c.bf16 (!%p204_p7), %v425_v19, %v424_v18  ;;  %v426_v21 = vld [vmem:[%s1006_s3 + $0x20] sm:$0xff] (!%p204_p7)  ;;  %v427_v22 = vld [vmem:[%s1006_s3 + $0x28] sm:$0xff] (!%p204_p7)  ;;  %v428_v24 = vld [vmem:[%s1006_s3 + $0x30] sm:$0xff] (!%p204_p7)  ;;  %s520_s27 = sshll.u32 (!%p204_p7), %s841_s26, 4  ;;  %s521_s27 = int_to_ptr.vmem [resolvable:$true] %s520_s27 }
  0x11   : > { %v711_v23 = vpack.c.bf16 (!%p204_p7), %v427_v22, %v426_v21  ;;  %v429_v25 = vld [vmem:[%s1006_s3 + $0x38] sm:$0xff] (!%p204_p7)  ;;  %s766_s5 = scalar_lea.vmem (!%p204_p7), %s521_s27, 128  ;;  %p773_p12 = scmp.lt.s32.totalorder (!%p204_p7), %s521_s27, %s521_s27 }
  0x12   : > { %706 = vmatpush3.bf16.msra.mxu0 (!%p204_p7), %v705_v17  ;;  %v714_v26 = vpack.c.bf16 (!%p204_p7), %v429_v25, %v428_v24  ;;  %p767_p9 = scmp.ne.s32.totalorder (!%p204_p7), %s521_s27, %s766_s5  ;;  %p774_p13 = scmp.lt.s32.totalorder (!%p204_p7), %s766_s5, %s766_s5 }
  0x13   : > { %s237_s8 = scalar_select %p236_p8, %s828_s17, 1  ;;  %697 = vmatpush3.bf16.msra.mxu1 %v696_v7  ;;  %707 = vmatprep.subr.bf16.mxu0 %v838_v3 }
  0x14   : > { %698 = vmatprep.subr.bf16.mxu1 %v838_v3  ;;  %p768_p10 = pnand %p767_p9, %p896_p3  ;;  %p775_p0 = por %p774_p13, %p773_p12 }
  0x15   : > { %s624_s13 = sshll.u32 %s237_s8, 3  ;;  %v421_v37 = vld [vmem:[#allocation2] sm:$0xff] }
  0x16   : > { %s239_s20 = scalar_lea.vmem %s1003_s0, %s624_s13  ;;  %709 = vmatpush3.bf16.msra.mxu0 %v708_v20  ;;  %p769_p11 = pneg %p768_p10 }
  0x17   : > { %v260_v10 = vld [vmem:[%s239_s20] sm:$0xff]  ;;  %710 = vmatprep.subr.bf16.mxu0 %v838_v3 }
  0x18   : > { %660 = vmatmul.mubr.msk.f32.vlgmr.msra.gmra.mrb[0].mxu1 %vm258_vm1, %v260_v10  ;;  %p776_p1 = pnand %p775_p0, %p769_p11 }
  0x19   : > { %700 = vmatpush3.bf16.msra.mxu1 %v699_v11  ;;  %670 = vmatprep.mubr.msk.f32.mxu1 %vm839_vm0, %v840_v6 }
  0x1a   : > { %701 = vmatprep.subr.bf16.mxu1 %v838_v3  ;;  %712 = vmatpush3.bf16.msra.mxu0 %v711_v23 }
  0x1b   : > { %713 = vmatprep.subr.bf16.mxu0 %v838_v3 }
  0x1d   : > { %703 = vmatpush3.bf16.msra.mxu1 %v702_v14 }
  0x1e   : > { %715 = vmatpush3.bf16.msra.mxu0 %v714_v26 }
  0x20   : > { %671 = vmatmul.mubr.msk.f32.vlgmr.msra.gmra.mrb[2].mxu1 %vm258_vm1, %v260_v10 }
  0xeb   : > { %v335_v27 = vpop.f32.mrb[0].mxu1 }
  0xec   : > { %v627_v28 = vmul.f32 -1.442695, %v335_v27  ;;  %v661_v29 = vpop.f32.mrb[1].mxu1 }
  0xee   : > { %762 = vpow2.f32 %v627_v28 }
  0xf3   : > { %v409_v30 = vpop.f32.mrb[2].mxu1 }
  0xf4   : > { %v672_v31 = vpop.f32.mrb[3].mxu1 }
  0xf8   : > { %v763_v32 = vpop.eup %762 }
  0xf9   : > { %v416_v33 = vadd.f32 1.0, %v763_v32 }
  0xfb   : > { %764 = vrcp.f32 %v416_v33 }
 0x105   : > { %v765_v34 = vpop.eup %764 }
 0x106   : > { %v419_v35 = vmul.f32 %v765_v34, %v335_v27 }
 0x108   : > { %v420_v36 = vmul.f32 %v419_v35, %v409_v30 }
 0x10a   : > { %690 = vmatmul.mubr.msk.f32.vlgmr.msra.gmra.mrb[0].mxu0 %vm430_vm2, %v420_v36 }
 0x1dd   : > { %v500_v38 = vpop.f32.mrb[0].mxu0 }
 0x1de   : > { %v504_v39 = vadd.f32 %v500_v38, %v421_v37  ;;  %v691_v40 = vpop.f32.mrb[1].mxu0 }
 0x1e0   : > { %505 = vst.msk [vmem:[#allocation2] sm:$0xff] %vm258_vm1, %v504_v39 }
 0x1e7   : > { %v509_v41 = vld [vmem:[#allocation2] sm:$0xff] }
 0x1e8   : > { %510 = vst.msk [vmem:[#allocation3] sm:$0xff] %vm258_vm1, %v509_v41 }
 0x1e9   : > { %779 = shalt.err (!%p776_p1)
}
 0x1ea   : > { %s780_s17 = scalar_lea.hbm %s518_s30, 128  ;;  %s784_s8 = scalar_lea.hbm %s1007_s4, 256 }
 0x1eb   : > { %p781_p2 = scmp.ne.s32.totalorder %s518_s30, %s780_s17  ;;  %p785_p6 = scmp.lt.u32.totalorder %s518_s30, %s1007_s4 }
 0x1ec   : > { %p786_p7 = scmp.lt.u32.totalorder %s784_s8, %s780_s17  ;;  %p788_p9 = scmp.lt.u32.totalorder %s780_s17, %s518_s30 }
 0x1ed   : > { %p782_p4 = pnand %p781_p2, %p896_p3 }
 0x1ee   : > { %p787_p8 = por %p786_p7, %p785_p6 }
 0x1ef   : > { %p783_p5 = pneg %p782_p4 }
 0x1f0   : > { %p789_p10 = por %p788_p9, %p787_p8 }
 0x1f2   : > { %p790_p11 = pnand %p789_p10, %p783_p5 }
 0x1f4   : > { %793 = shalt.err (!%p790_p11)
}
 0x1f5   : > { %716 = dma.vmem_to_hbm [thread:$0]  (%p896_p3), %s521_s27, 128, %s518_s30, [#allocation4]  }
 0x1f6   : > { %815 = dma.done.wait (%p896_p3), [#allocation4], 128  }
 0x1f7   : > { %817 = vsyncadd (%p896_p3), [#allocation4], 4294967168 }
 0x1f8 PF: > { %s15_s19 = sadd.s32 1, %s836_s19   ;;  %s1009_s15 = smov %s824_s16 }
 0x1f9   : > { %p12_p12 = scmp.ge.s32.totalorder %s15_s19, 4   ;;  %s1010_s16 = smov %s905_s25 }
 0x1fa   : > { %s1011_s17 = smov %s832_s18  ;;  %s1012_s18 = smov %s1014_s21 }
 0x1fb   :  { %14 = sbr.rel (!%p12_p12) target bundleno = 3 (0x3), region = 81 }
 0x202   :  { %533 = vsyncpa [#allocation4], 1 }
 0x203   :  { %535 = vsyncpa [#allocation4 + $0x1], 1 }

// kernel: tpu_custom_call.1
= control target key start
LH: loop header
LB: loop body
LE: loop exit
PB: predicated region body
PF: predicated region fallthrough
CT: control target
= control target key end

     0   :  { %9 = vsyncpa [#allocation4], 0  ;;  %s1085_s0 = inlined_call_operand.vmem [shape: f32[16,32], index: 0, kind: input, shape index: {}]   ;;  %s1086_s1 = inlined_call_operand.vmem [shape: f32[32,64], index: 1, kind: input, shape index: {}]   ;;  %s1087_s2 = inlined_call_operand.vmem [shape: f32[32,64], index: 2, kind: input, shape index: {}]   ;;  %s1088_s3 = inlined_call_operand.vmem [shape: f32[64,32], index: 3, kind: input, shape index: {}]   ;;  %s1089_s4 = inlined_call_operand.hbm [shape: f32[16,32], index: 4, kind: output, shape index: {}]  }
   0x1   :  { %11 = vsyncpa [#allocation4 + $0x1], 0  ;;  %s917_s15 = smov 0   ;;  %s919_s16 = smov 0  }
   0x2   :  { %s921_s17 = smov 0   ;;  %s923_s18 = smov 0  }
   0x3   :  { %s925_s19 = smov 0   ;;  %s927_s20 = smov 0  }
   0x4 LB: > { %s644_s21 = sadd.s32 4294967295, %s886_s20   ;;  %s645_s22 = sadd.s32 4294967294, %s886_s20   ;;  %s886_s20 = sphi %s927_s20, %s17_s20   ;;  %s882_s19 = sphi %s925_s19, %s1096_s19   ;;  %s878_s18 = sphi %s923_s18, %s1095_s18   ;;  %s874_s17 = sphi %s921_s17, %s1094_s17   ;;  %s870_s16 = sphi %s919_s16, %s1093_s16   ;;  %s866_s15 = sphi %s917_s15, %s1092_s15  }
   0x5   : > { %s29_s23 = sadd.s32 1, %s882_s19  ;;  %s140_s24 = sadd.s32 1, %s874_s17 }
   0x6   : > { %p31_p0 = scmp.ge.s32.totalorder %s29_s23, 2  ;;  %p150_p1 = scmp.ne.s32.totalorder %s874_s17, %s870_s16 }
   0x7   : > { %p151_p2 = scmp.eq.s32.totalorder %s644_s21, 1  ;;  %p156_p3 = scmp.ne.s32.totalorder %s870_s16, %s866_s15 }
   0x8   : > { %s1098_s23 = smov (%p31_p0, %s29_s23), 0  ;;  %p157_p5 = scmp.eq.s32.totalorder %s645_s22, 1 }
   0x9   : > { %p957_p4 = por %p151_p2, %p150_p1  ;;  %s137_s26 = ssub.s32 %s882_s19, %s1098_s23 }
   0xa   : > { %p651_p6 = scmp.ge.s32.totalorder %s886_s20, 1  ;;  %p138_p7 = scmp.eq.s32.totalorder %s137_s26, 0 }
   0xb   : > { %p964_p8 = por %p157_p5, %p156_p3  ;;  %p205_p9 = scmp.lt.s32.totalorder %s886_s20, 3 }
   0xc   : > { %s970_s28 = scalar_select %p138_p7, %s874_s17, %s140_s24  }
   0xd   : > { %p206_p10 = pnand %p651_p6, %p205_p9 }
   0xe   : > { %v268_v0 = vld [vmem:[%s1086_s1] sm:$0xff] (!%p206_p10)  ;;  %v269_v1 = vld [vmem:[%s1086_s1 + $0x8] sm:$0xff] (!%p206_p10)  ;;  %v270_v2 = vld [vmem:[%s1086_s1 + $0x10] sm:$0xff] (!%p206_p10)  ;;  %v888_v3 = vmov (!%p206_p10), 0.0|0.0   ;;  %vm889_vm0 = vmmov (!%p206_p10), 0   ;;  %v890_v6 = vmov (!%p206_p10), 0.0  }
   0xf   : > { %209 = sbr.rel (%p206_p10) target bundleno = 505 (0x1f9), region = 36  ;;  %722 = vmatprep.subr.bf16.mxu1 (!%p206_p10), %v888_v3  ;;  %v723_v4 = vpack.c.bf16 (!%p206_p10), %v269_v1, %v268_v0  ;;  %v271_v5 = vld [vmem:[%s1086_s1 + $0x18] sm:$0xff] (!%p206_p10)  ;;  %689 = vmatprep.mubr.msk.f32.mxu1 (!%p206_p10), %vm889_vm0, %v890_v6  ;;  %p243_p11 = scmp.lt.s32.totalorder (!%p206_p10), %s878_s18, 1  ;;  %vm265_vm1 = vcmask (!%p206_p10), 261120   ;;  %v346_v8 = vld [vmem:[%s1087_s2] sm:$0xff] (!%p206_p10)  ;;  %v347_v9 = vld [vmem:[%s1087_s2 + $0x8] sm:$0xff] (!%p206_p10) }
  0x10   : > { %266 = vst.msk [vmem:[#allocation2] sm:$0xff] (!%p206_p10), %vm265_vm1, %v890_v6  ;;  %734 = vmatprep.subr.bf16.mxu0 (!%p206_p10), %v888_v3  ;;  %719 = vmatprep.mubr.msk.f32.mxu0 (!%p206_p10), %vm889_vm0, %v890_v6  ;;  %v726_v7 = vpack.c.bf16 (!%p206_p10), %v271_v5, %v270_v2  ;;  %v729_v11 = vpack.c.bf16 (!%p206_p10), %v347_v9, %v346_v8  ;;  %v348_v12 = vld [vmem:[%s1087_s2 + $0x10] sm:$0xff] (!%p206_p10)  ;;  %v349_v13 = vld [vmem:[%s1087_s2 + $0x18] sm:$0xff] (!%p206_p10)  ;;  %v429_v15 = vld [vmem:[%s1088_s3] sm:$0xff] (!%p206_p10)  ;;  %vm437_vm2 = vcmask (!%p206_p10), 523264   ;;  %s240_s8 = sand.u32 (!%p206_p10), 1, %s870_s16  }
  0x11   : > { %724 = vmatpush3.bf16.msra.mxu1 (!%p206_p10), %v723_v4  ;;  %v732_v14 = vpack.c.bf16 (!%p206_p10), %v349_v13, %v348_v12  ;;  %v430_v16 = vld [vmem:[%s1088_s3 + $0x8] sm:$0xff] (!%p206_p10)  ;;  %v431_v18 = vld [vmem:[%s1088_s3 + $0x10] sm:$0xff] (!%p206_p10)  ;;  %v432_v19 = vld [vmem:[%s1088_s3 + $0x18] sm:$0xff] (!%p206_p10)  ;;  %s652_s9 = sshll.u32 (!%p206_p10), %s240_s8, 3  ;;  %s659_s10 = sshll.u32 (!%p206_p10), %s878_s18, 7 }
  0x12   : > { %725 = vmatprep.subr.bf16.mxu1 (!%p206_p10), %v888_v3  ;;  %v735_v17 = vpack.c.bf16 (!%p206_p10), %v430_v16, %v429_v15  ;;  %v738_v20 = vpack.c.bf16 (!%p206_p10), %v432_v19, %v431_v18  ;;  %v433_v21 = vld [vmem:[%s1088_s3 + $0x20] sm:$0xff] (!%p206_p10)  ;;  %v434_v22 = vld [vmem:[%s1088_s3 + $0x28] sm:$0xff] (!%p206_p10)  ;;  %v435_v24 = vld [vmem:[%s1088_s3 + $0x30] sm:$0xff] (!%p206_p10)  ;;  %s1037_s21 = scalar_lea.hbm (!%p206_p10), %s1089_s4, %s659_s10 }
  0x13   : > { %v741_v23 = vpack.c.bf16 (!%p206_p10), %v434_v22, %v433_v21  ;;  %v436_v25 = vld [vmem:[%s1088_s3 + $0x38] sm:$0xff] (!%p206_p10) }
  0x14   : > { %736 = vmatpush3.bf16.msra.mxu0 (!%p206_p10), %v735_v17  ;;  %v744_v26 = vpack.c.bf16 (!%p206_p10), %v436_v25, %v435_v24 }
  0x15   : > { %727 = vmatpush3.bf16.msra.mxu1 (!%p206_p10), %v726_v7  ;;  %737 = vmatprep.subr.bf16.mxu0 (!%p206_p10), %v888_v3 }
  0x16   : > { %s244_s11 = scalar_select %p243_p11, %s878_s18, 1  ;;  %728 = vmatprep.subr.bf16.mxu1 %v888_v3 }
  0x17   : > { %v428_v37 = vld [vmem:[#allocation2] sm:$0xff]  ;;  %s891_s18 = smov [#allocation3]  }
  0x18   : > { %s653_s22 = sshll.u32 %s244_s11, 3  ;;  %739 = vmatpush3.bf16.msra.mxu0 %v738_v20  ;;  %s242_s11 = scalar_lea.vmem [#allocation3], %s652_s9 }
  0x19   : > { %s246_s29 = scalar_lea.vmem %s1085_s0, %s653_s22  ;;  %740 = vmatprep.subr.bf16.mxu0 %v888_v3  ;;  %s532_s12 = sshll.u32 %s242_s11, 4  ;;  %s1039_s12 = int_to_ptr.vmem [resolvable:$true] %s532_s12 }
  0x1a   : > { %v267_v10 = vld [vmem:[%s246_s29] sm:$0xff]  ;;  %s519_s22 = scalar_lea.sflag [#allocation4], %s240_s8  ;;  %s808_s24 = scalar_lea.vmem %s1039_s12, 128 }
  0x1b   : > { %690 = vmatmul.mubr.msk.f32.vlgmr.msra.gmra.mrb[0].mxu1 %vm265_vm1, %v267_v10  ;;  %p809_p12 = scmp.ne.s32.totalorder %s1039_s12, %s808_s24  ;;  %s812_s26 = sshll.u32 %s891_s18, 4  ;;  %s813_s26 = int_to_ptr.vmem [resolvable:$false] %s812_s26 }
  0x1c   : > { %730 = vmatpush3.bf16.msra.mxu1 %v729_v11  ;;  %700 = vmatprep.mubr.msk.f32.mxu1 %vm889_vm0, %v890_v6  ;;  %s814_s29 = scalar_lea.vmem %s813_s26, 256  ;;  %p815_p1 = scmp.lt.s32.totalorder %s1039_s12, %s813_s26 }
  0x1d   : > { %731 = vmatprep.subr.bf16.mxu1 %v888_v3  ;;  %742 = vmatpush3.bf16.msra.mxu0 %v741_v23  ;;  %p810_p13 = pnand %p809_p12, %p957_p4  ;;  %p816_p2 = scmp.lt.s32.totalorder %s814_s29, %s808_s24 }
  0x1e   : > { %743 = vmatprep.subr.bf16.mxu0 %v888_v3 }
  0x1f   : > { %p811_p0 = pneg %p810_p13  ;;  %p817_p3 = por %p816_p2, %p815_p1 }
  0x20   : > { %733 = vmatpush3.bf16.msra.mxu1 %v732_v14 }
  0x21   : > { %745 = vmatpush3.bf16.msra.mxu0 %v744_v26  ;;  %p818_p5 = pnand %p817_p3, %p811_p0 }
  0x23   : > { %701 = vmatmul.mubr.msk.f32.vlgmr.msra.gmra.mrb[2].mxu1 %vm265_vm1, %v267_v10 }
  0xee   : > { %v342_v27 = vpop.f32.mrb[0].mxu1 }
  0xef   : > { %v656_v28 = vmul.f32 -1.442695, %v342_v27  ;;  %v691_v29 = vpop.f32.mrb[1].mxu1 }
  0xf1   : > { %804 = vpow2.f32 %v656_v28 }
  0xf6   : > { %v416_v30 = vpop.f32.mrb[2].mxu1 }
  0xf7   : > { %v702_v31 = vpop.f32.mrb[3].mxu1 }
  0xfb   : > { %v805_v32 = vpop.eup %804 }
  0xfc   : > { %v423_v33 = vadd.f32 1.0, %v805_v32 }
  0xfe   : > { %806 = vrcp.f32 %v423_v33 }
 0x108   : > { %v807_v34 = vpop.eup %806 }
 0x109   : > { %v426_v35 = vmul.f32 %v807_v34, %v342_v27 }
 0x10b   : > { %v427_v36 = vmul.f32 %v426_v35, %v416_v30 }
 0x10d   : > { %720 = vmatmul.mubr.msk.f32.vlgmr.msra.gmra.mrb[0].mxu0 %vm437_vm2, %v427_v36 }
 0x1e0   : > { %v507_v38 = vpop.f32.mrb[0].mxu0 }
 0x1e1   : > { %v511_v39 = vadd.f32 %v507_v38, %v428_v37  ;;  %v721_v40 = vpop.f32.mrb[1].mxu0 }
 0x1e3   : > { %512 = vst.msk [vmem:[#allocation2] sm:$0xff] %vm265_vm1, %v511_v39 }
 0x1ea   : > { %v516_v41 = vld [vmem:[#allocation2] sm:$0xff] }
 0x1eb   : > { %517 = vst.msk [vmem:[%s242_s11] sm:$0xff] %vm265_vm1, %v516_v41 }
 0x1ec   : > { %821 = shalt.err (!%p818_p5)
}
 0x1ed   : > { %s822_s30 = scalar_lea.hbm %s1037_s21, 128  ;;  %s826_s7 = scalar_lea.hbm %s1089_s4, 256 }
 0x1ee   : > { %p823_p6 = scmp.ne.s32.totalorder %s1037_s21, %s822_s30  ;;  %p827_p10 = scmp.lt.u32.totalorder %s1037_s21, %s1089_s4 }
 0x1ef   : > { %p828_p11 = scmp.lt.u32.totalorder %s826_s7, %s822_s30  ;;  %p830_p13 = scmp.lt.u32.totalorder %s822_s30, %s1037_s21 }
 0x1f0   : > { %p824_p7 = pnand %p823_p6, %p957_p4 }
 0x1f1   : > { %p829_p12 = por %p828_p11, %p827_p10 }
 0x1f2   : > { %p825_p9 = pneg %p824_p7 }
 0x1f3   : > { %p831_p0 = por %p830_p13, %p829_p12 }
 0x1f5   : > { %p832_p1 = pnand %p831_p0, %p825_p9 }
 0x1f7   : > { %835 = shalt.err (!%p832_p1)
}
 0x1f8   : > { %746 = dma.vmem_to_hbm [thread:$0]  (%p957_p4), %s1039_s12, 128, %s1037_s21, %s519_s22  }
 0x1f9 PF: > { %p752_p2 = scmp.ge.s32.totalorder %s886_s20, 2  ;;  %s544_s10 = sand.u32 1, %s866_s15  }
 0x1fa   : > { %s545_s11 = scalar_lea.sflag [#allocation4], %s544_s10 }
 0x1fb   : > { %p749_p3 = pnand %p752_p2, %p964_p8 }
 0x1fd   : > { %861 = dma.done.wait (!%p749_p3), %s545_s11, 128  }
 0x1fe   : > { %863 = vsyncadd (!%p749_p3), %s545_s11, 4294967168  ;;  %s17_s20 = sadd.s32 1, %s886_s20   ;;  %s1092_s15 = smov %s870_s16 }
 0x1ff   : > { %p14_p5 = scmp.ge.s32.totalorder %s17_s20, 4   ;;  %s1093_s16 = smov %s874_s17 }
 0x200   : > { %s1094_s17 = smov %s970_s28  ;;  %s1095_s18 = smov %s882_s19 }
 0x201   : > { %s1096_s19 = smov %s1098_s23  ;;  %16 = sbr.rel (!%p14_p5) target bundleno = 4 (0x4), region = 88 }
 0x208   :  { %550 = vsyncpa [#allocation4], 1 }
 0x209   :  { %552 = vsyncpa [#allocation4 + $0x1], 1 }

</bundles_post_ra>
